<compile_context>
chip_gen: v6e
topology: v6e:2x2x1
jax: 0.10.0
libtpu: 0.0.40
codegen_flags: <defaults>
</compile_context>

<pallas_src>
import functools

import jax
import jax.numpy as jnp
from jax.experimental import pallas as pl
from jax.experimental.pallas import tpu as pltpu


def _round_up(x, m):
    return ((x + m - 1) // m) * m


def _mlp_mean_kernel(n_linear, *refs):
    """One batch-tile of the mean_net MLP.

    refs layout:
      refs[0]                  : obs tile   (TB, ob_dim)
      refs[1 : 1 + 2*n_linear] : w0, b0, w1, b1, ...  (W: (in,out), b: (1,out))
      refs[1 + 2*n_linear]     : mean tile  (TB, ac_dim)
    """
    obs_ref = refs[0]
    w_refs = refs[1:1 + 2 * n_linear:2]
    b_refs = refs[2:2 + 2 * n_linear:2]
    mean_ref = refs[1 + 2 * n_linear]

    x = obs_ref[...]
    for i in range(n_linear):
        x = jnp.dot(x, w_refs[i][...],
                    preferred_element_type=jnp.float32,
                    precision=jax.lax.Precision.HIGHEST) + b_refs[i][...]
        if i < n_linear - 1:          # hidden layers use tanh, output is identity
            x = jnp.tanh(x)
    mean_ref[...] = x.astype(mean_ref.dtype)


def mlp_policy_forward(obs, params, logstd, *, ac_dim, block_b=4096,
                       vmem_limit_bytes=48 * 1024 * 1024):
    """Continuous MLPPolicy.forward.

    Returns (batch_mean, std):
      batch_mean : (B, ac_dim)   -- mean_net(obs)
      std        : (ac_dim,)     -- exp(logstd)
    The action distribution is MultivariateNormal(batch_mean, diag(std));
    the dense (B, ac_dim, ac_dim) scale_tril is intentionally NOT materialized
    (it would dominate HBM write traffic just to store ac_dim constants) --
    use make_scale_tril(std, B) if a downstream consumer needs it densely.

    params : list of (W, b) with W shaped (in, out), b shaped (1, out).
    logstd : (1, ac_dim) float32.
    block_b: max batch rows per grid step (sweep 2048-8192; up to ~16384 on
             v5e/v6e which have 128 MiB VMEM).
    """
    batch, ob_dim = obs.shape
    n_linear = len(params)

    # ---- batch-tile selection ------------------------------------------------
    block_b = max(8, (block_b // 8) * 8)          # sublane multiple
    if batch <= 8:
        tb = batch                                # single block, dims == array dims
    else:
        tb = max(8, min(block_b, (batch // 8) * 8))
        # >= 2 grid steps when possible so both v7x TensorCores are fed
        # (grid axis is "parallel"); harmless on 1-TC v5e/v6e.
        if batch >= 16 and pl.cdiv(batch, tb) < 2:
            tb = _round_up(pl.cdiv(batch, 2), 8)
    grid = (pl.cdiv(batch, tb),)
    # No jnp.pad: the ragged final block is handled by Pallas (masked boundary
    # writes), so obs HBM traffic is a single streaming pass.

    in_specs = [pl.BlockSpec((tb, ob_dim), lambda i: (i, 0))]
    flat_inputs = [obs]
    for (w, b) in params:
        # Constant index_map -> weights/biases DMA'd once, VMEM-resident.
        in_specs.append(pl.BlockSpec(w.shape, lambda i: (0, 0)))
        in_specs.append(pl.BlockSpec(b.shape, lambda i: (0, 0)))
        flat_inputs += [w, b]

    kernel = functools.partial(_mlp_mean_kernel, n_linear)
    mean = pl.pallas_call(
        kernel,
        out_shape=jax.ShapeDtypeStruct((batch, ac_dim), jnp.float32),
        grid=grid,
        in_specs=in_specs,
        out_specs=pl.BlockSpec((tb, ac_dim), lambda i: (i, 0)),
        compiler_params=pltpu.CompilerParams(
            dimension_semantics=("parallel",),
            vmem_limit_bytes=vmem_limit_bytes,
        ),
    )(*flat_inputs)

    std = jnp.exp(logstd[0])                      # (ac_dim,), batch-independent
    return mean, std
    # TODO(synk): torch.distributions.MultivariateNormal / .sample() has no
    # Pallas equivalent; we return the distribution parameters (mean, std).


def make_scale_tril(std, batch):
    """Dense (batch, ac_dim, ac_dim) scale_tril = diag(std) repeated over batch.

    Only call this if a consumer truly needs the dense tensor; keep it fused
    with that consumer (inside the same jit) to avoid the HBM materialization.
    """
    ac_dim = std.shape[0]
    return jnp.broadcast_to(jnp.diag(std)[None, :, :], (batch, ac_dim, ac_dim))


def build_mlp_params(key, ob_dim, ac_dim, n_layers, size):
    """Deterministic init matching ptu.build_mlp layer shapes:
    n_layers hidden Linear(in, size) + tanh, then Linear(size, ac_dim)."""
    dims = [ob_dim] + [size] * n_layers + [ac_dim]
    params = []
    for i in range(len(dims) - 1):
        key, kw = jax.random.split(key)
        fan_in = dims[i]
        bound = 1.0 / jnp.sqrt(fan_in)
        w = jax.random.uniform(kw, (dims[i], dims[i + 1]),
                               minval=-bound, maxval=bound,
                               dtype=jnp.float32)
        b = jnp.zeros((1, dims[i + 1]), dtype=jnp.float32)
        params.append((w, b))
    return params


def _reference_forward(obs, params, logstd, ac_dim):
    x = obs
    for i, (w, b) in enumerate(params):
        x = jnp.dot(x, w, precision=jax.lax.Precision.HIGHEST) + b
        if i < len(params) - 1:
            x = jnp.tanh(x)
    ref_mean = x
    ref_tril = jnp.broadcast_to(jnp.diag(jnp.exp(logstd[0]))[None],
                                (obs.shape[0], ac_dim, ac_dim))
    return ref_mean, ref_tril


if __name__ == "__main__":
    # Small shapes consistent with MLPPolicy(ac_dim, ob_dim, n_layers, size)
    ob_dim, ac_dim, n_layers, size = 16, 4, 2, 32

    key = jax.random.PRNGKey(0)
    params = build_mlp_params(key, ob_dim, ac_dim, n_layers, size)
    logstd = jnp.zeros((1, ac_dim), dtype=jnp.float32)  # nn.Parameter(zeros(ac_dim))

    # Case 1: tiny batch (single block whose dims equal the array dims)
    key, k_obs = jax.random.split(key)
    obs_small = jax.random.normal(k_obs, (8, ob_dim), dtype=jnp.float32)
    mean_s, std_s = mlp_policy_forward(obs_small, params, logstd, ac_dim=ac_dim)
    jax.block_until_ready((mean_s, std_s))
    ref_mean_s, ref_tril_s = _reference_forward(obs_small, params, logstd, ac_dim)
    assert jnp.allclose(mean_s, ref_mean_s, atol=1e-5, rtol=1e-5)
    assert jnp.allclose(make_scale_tril(std_s, obs_small.shape[0]),
                        ref_tril_s, atol=1e-6)

    # Case 2: default (large) tile -> >=2-step clamp kicks in, ragged last block
    key, k_obs = jax.random.split(key)
    obs_big = jax.random.normal(k_obs, (300, ob_dim), dtype=jnp.float32)
    mean_b, std_b = mlp_policy_forward(obs_big, params, logstd, ac_dim=ac_dim)
    jax.block_until_ready((mean_b, std_b))
    ref_mean_b, ref_tril_b = _reference_forward(obs_big, params, logstd, ac_dim)
    assert jnp.allclose(mean_b, ref_mean_b, atol=1e-5, rtol=1e-5)
    assert jnp.allclose(make_scale_tril(std_b, obs_big.shape[0]),
                        ref_tril_b, atol=1e-6)

    # Case 3: small explicit tile -> multi-step grid + ragged last block
    mean_c, std_c = mlp_policy_forward(obs_big, params, logstd,
                                       ac_dim=ac_dim, block_b=128)
    jax.block_until_ready((mean_c, std_c))
    assert jnp.allclose(mean_c, ref_mean_b, atol=1e-5, rtol=1e-5)

    print("KERNEL_OK")
</pallas_src>

<mosaic_0001>
module attributes {stable_mosaic.version = 11 : i64} {
  func.func @_mlp_mean_kernel(%arg0: i32, %arg1: memref<8x16xf32, #tpu.memory_space<vmem>>, %arg2: memref<16x32xf32, #tpu.memory_space<vmem>>, %arg3: memref<1x32xf32, #tpu.memory_space<vmem>>, %arg4: memref<32x32xf32, #tpu.memory_space<vmem>>, %arg5: memref<1x32xf32, #tpu.memory_space<vmem>>, %arg6: memref<32x4xf32, #tpu.memory_space<vmem>>, %arg7: memref<1x4xf32, #tpu.memory_space<vmem>>, %arg8: memref<8x4xf32, #tpu.memory_space<vmem>>) attributes {dimension_semantics = [#tpu.dimension_semantics<parallel>], iteration_bounds = array<i64: 1>, scalar_prefetch = 0 : i64, scratch_operands = 0 : i64, tpu.core_type = #tpu.core_type<tc>, window_params = [{transform_indices = @transform_0, window_bounds = array<i64: 8, 16>}, {pipeline_mode = #tpu.pipeline_mode<synchronous>, transform_indices = @transform_1, window_bounds = array<i64: 16, 32>}, {pipeline_mode = #tpu.pipeline_mode<synchronous>, transform_indices = @transform_2, window_bounds = array<i64: 1, 32>}, {pipeline_mode = #tpu.pipeline_mode<synchronous>, transform_indices = @transform_3, window_bounds = array<i64: 32, 32>}, {pipeline_mode = #tpu.pipeline_mode<synchronous>, transform_indices = @transform_4, window_bounds = array<i64: 1, 32>}, {pipeline_mode = #tpu.pipeline_mode<synchronous>, transform_indices = @transform_5, window_bounds = array<i64: 32, 4>}, {pipeline_mode = #tpu.pipeline_mode<synchronous>, transform_indices = @transform_6, window_bounds = array<i64: 1, 4>}, {transform_indices = @transform_7, window_bounds = array<i64: 8, 4>}]} {
    %c0 = arith.constant 0 : index
    %c0_0 = arith.constant 0 : index
    %0 = vector.load %arg1[%c0, %c0_0] : memref<8x16xf32, #tpu.memory_space<vmem>>, vector<8x16xf32>
    %c0_1 = arith.constant 0 : index
    %c0_2 = arith.constant 0 : index
    %1 = vector.load %arg2[%c0_1, %c0_2] : memref<16x32xf32, #tpu.memory_space<vmem>>, vector<16x32xf32>
    %cst = arith.constant dense<0.000000e+00> : vector<8x32xf32>
    %2 = tpu.matmul %0, %1, %cst {dimension_numbers = #tpu.dot_dimension_numbers<[1], [0], [0], [1], [0, 0, 1, 1], [], []>, precision = #tpu.contract_precision<fp32>} : vector<8x16xf32>, vector<16x32xf32>, vector<8x32xf32> -> vector<8x32xf32>
    %c0_3 = arith.constant 0 : index
    %c0_4 = arith.constant 0 : index
    %3 = vector.load %arg3[%c0_3, %c0_4] : memref<1x32xf32, #tpu.memory_space<vmem>>, vector<1x32xf32>
    %4 = vector.broadcast %3 : vector<1x32xf32> to vector<8x32xf32>
    %5 = arith.addf %2, %4 : vector<8x32xf32>
    %6 = math.tanh %5 : vector<8x32xf32>
    %c0_5 = arith.constant 0 : index
    %c0_6 = arith.constant 0 : index
    %7 = vector.load %arg4[%c0_5, %c0_6] : memref<32x32xf32, #tpu.memory_space<vmem>>, vector<32x32xf32>
    %cst_7 = arith.constant dense<0.000000e+00> : vector<8x32xf32>
    %8 = tpu.matmul %6, %7, %cst_7 {dimension_numbers = #tpu.dot_dimension_numbers<[1], [0], [0], [1], [0, 0, 1, 1], [], []>, precision = #tpu.contract_precision<fp32>} : vector<8x32xf32>, vector<32x32xf32>, vector<8x32xf32> -> vector<8x32xf32>
    %c0_8 = arith.constant 0 : index
    %c0_9 = arith.constant 0 : index
    %9 = vector.load %arg5[%c0_8, %c0_9] : memref<1x32xf32, #tpu.memory_space<vmem>>, vector<1x32xf32>
    %10 = vector.broadcast %9 : vector<1x32xf32> to vector<8x32xf32>
    %11 = arith.addf %8, %10 : vector<8x32xf32>
    %12 = math.tanh %11 : vector<8x32xf32>
    %c0_10 = arith.constant 0 : index
    %c0_11 = arith.constant 0 : index
    %13 = vector.load %arg6[%c0_10, %c0_11] : memref<32x4xf32, #tpu.memory_space<vmem>>, vector<32x4xf32>
    %cst_12 = arith.constant dense<0.000000e+00> : vector<8x4xf32>
    %14 = tpu.matmul %12, %13, %cst_12 {dimension_numbers = #tpu.dot_dimension_numbers<[1], [0], [0], [1], [0, 0, 1, 1], [], []>, precision = #tpu.contract_precision<fp32>} : vector<8x32xf32>, vector<32x4xf32>, vector<8x4xf32> -> vector<8x4xf32>
    %c0_13 = arith.constant 0 : index
    %c0_14 = arith.constant 0 : index
    %15 = vector.load %arg7[%c0_13, %c0_14] : memref<1x4xf32, #tpu.memory_space<vmem>>, vector<1x4xf32>
    %16 = vector.broadcast %15 : vector<1x4xf32> to vector<8x4xf32>
    %17 = arith.addf %14, %16 : vector<8x4xf32>
    %c0_15 = arith.constant 0 : index
    %c0_16 = arith.constant 0 : index
    %18 = vector.load %arg8[%c0_15, %c0_16] : memref<8x4xf32, #tpu.memory_space<vmem>>, vector<8x4xf32>
    tpu.vector_store %arg8[%c0_15, %c0_16], %17 {strides = array<i32>} : memref<8x4xf32, #tpu.memory_space<vmem>>, vector<8x4xf32>,
    return
  }
  func.func @transform_0(%arg0: i32) -> (i32, i32) {
    %c0_i32 = arith.constant 0 : i32
    %c0_i32_0 = arith.constant 0 : i32
    return %arg0, %c0_i32 : i32, i32
  }
  func.func @transform_1(%arg0: i32) -> (i32, i32) {
    %c0_i32 = arith.constant 0 : i32
    %c0_i32_0 = arith.constant 0 : i32
    %c0_i32_1 = arith.constant 0 : i32
    return %c0_i32, %c0_i32_0 : i32, i32
  }
  func.func @transform_2(%arg0: i32) -> (i32, i32) {
    %c0_i32 = arith.constant 0 : i32
    %c0_i32_0 = arith.constant 0 : i32
    %c0_i32_1 = arith.constant 0 : i32
    return %c0_i32, %c0_i32_0 : i32, i32
  }
  func.func @transform_3(%arg0: i32) -> (i32, i32) {
    %c0_i32 = arith.constant 0 : i32
    %c0_i32_0 = arith.constant 0 : i32
    %c0_i32_1 = arith.constant 0 : i32
    return %c0_i32, %c0_i32_0 : i32, i32
  }
  func.func @transform_4(%arg0: i32) -> (i32, i32) {
    %c0_i32 = arith.constant 0 : i32
    %c0_i32_0 = arith.constant 0 : i32
    %c0_i32_1 = arith.constant 0 : i32
    return %c0_i32, %c0_i32_0 : i32, i32
  }
  func.func @transform_5(%arg0: i32) -> (i32, i32) {
    %c0_i32 = arith.constant 0 : i32
    %c0_i32_0 = arith.constant 0 : i32
    %c0_i32_1 = arith.constant 0 : i32
    return %c0_i32, %c0_i32_0 : i32, i32
  }
  func.func @transform_6(%arg0: i32) -> (i32, i32) {
    %c0_i32 = arith.constant 0 : i32
    %c0_i32_0 = arith.constant 0 : i32
    %c0_i32_1 = arith.constant 0 : i32
    return %c0_i32, %c0_i32_0 : i32, i32
  }
  func.func @transform_7(%arg0: i32) -> (i32, i32) {
    %c0_i32 = arith.constant 0 : i32
    %c0_i32_0 = arith.constant 0 : i32
    return %arg0, %c0_i32 : i32, i32
  }
}

</mosaic_0001>

<bundles_post_ra>
// kernel: tpu_custom_call.1
= control target key start
LH: loop header
LB: loop body
LE: loop exit
PB: predicated region body
PF: predicated region fallthrough
CT: control target
= control target key end

     0   :  { %12 = vsyncpa [#allocation3], 0  ;;  %s2149_s0 = inlined_call_operand.vmem [shape: f32[8,16], index: 0, kind: input, shape index: {}]   ;;  %s2150_s1 = inlined_call_operand.hbm [shape: f32[16,32], index: 1, kind: input, shape index: {}]   ;;  %s2151_s2 = inlined_call_operand.vmem [shape: f32[1,32], index: 2, kind: input, shape index: {}]   ;;  %s2152_s3 = inlined_call_operand.vmem [shape: f32[32,32], index: 3, kind: input, shape index: {}]   ;;  %s2153_s4 = inlined_call_operand.hbm [shape: f32[1,32], index: 4, kind: input, shape index: {}]   ;;  %s2154_s5 = inlined_call_operand.vmem [shape: f32[32,4], index: 5, kind: input, shape index: {}]   ;;  %s2155_s6 = inlined_call_operand.vmem [shape: f32[1,4], index: 6, kind: input, shape index: {}]   ;;  %s2156_s7 = inlined_call_operand.vmem [shape: f32[8,4], index: 7, kind: output, shape index: {}]  }
   0x1   :  { %13 = vsyncpa [#allocation5], 0  ;;  %s1843_s24 = smov [#allocation2]  }
   0x2   :  { %s21_s25 = sshll.u32 %s1843_s24, 4  ;;  %s22_s25 = int_to_ptr.vmem [resolvable:$true] %s21_s25 }
   0x3   :  { %s1807_s26 = scalar_lea.vmem %s22_s25, 256  ;;  %p1812_p1 = scmp.lt.s32.totalorder %s22_s25, %s22_s25 }
   0x4   :  { %p1808_p0 = scmp.ne.s32.totalorder %s22_s25, %s1807_s26  ;;  %p1813_p2 = scmp.lt.s32.totalorder %s1807_s26, %s1807_s26 }
   0x6   :  { %p1814_p3 = por %p1813_p2, %p1812_p1 }
   0x8   :  { %p1815_p4 = pnand %p1814_p3, %p1808_p0 }
   0xa   :  { %1818 = shalt.err (!%p1815_p4)
}
   0xb   :  { %s1844_s27 = smov 128   ;;  %s1845_s28 = smov 8  }
   0xc   :  { %27 = dma.hbm_to_vmem [thread:$0]  %s2150_s1, 256, %s22_s25, [#allocation3], %s1844_s27, %s1844_s27, %s1845_s28  }
   0xd   :  { %s1846_s8 = smov [#allocation4]  }
   0xe   :  { %s38_s9 = sshll.u32 %s1846_s8, 4  ;;  %s39_s9 = int_to_ptr.vmem [resolvable:$true] %s38_s9 }
   0xf   :  { %s1827_s10 = scalar_lea.vmem %s39_s9, 16  ;;  %s1831_s11 = scalar_lea.vmem %s39_s9, 32 }
  0x10   :  { %p1828_p5 = scmp.ne.s32.totalorder %s39_s9, %s1827_s10  ;;  %p1832_p6 = scmp.lt.s32.totalorder %s39_s9, %s39_s9 }
  0x11   :  { %p1833_p7 = scmp.lt.s32.totalorder %s1831_s11, %s1827_s10 }
  0x13   :  { %p1834_p8 = por %p1833_p7, %p1832_p6 }
  0x15   :  { %p1835_p9 = pnand %p1834_p8, %p1828_p5 }
  0x17   :  { %1838 = shalt.err (!%p1835_p9)
}
  0x18   :  { %41 = dma.hbm_to_vmem [thread:$0]  %s2153_s4, 16, %s39_s9, [#allocation5]  }
  0x19   :  { %1839 = dma.done.wait [#allocation3], 256  }
  0x1a   :  { %1840 = vsyncadd [#allocation3], 4294967040 }
  0x1b   :  { %1841 = dma.done.wait [#allocation5], 16  }
  0x1c   :  { %1842 = vsyncadd [#allocation5], 4294967280  ;;  %v1847_v0 = vmov 0.0   ;;  %vm1848_vm0 = vmmov 0   ;;  %vm62_vm1 = vcmask 130048   ;;  %v54_v1 = vld [vmem:[#allocation2 + $0x8] sm:$0xff] }
  0x1d   :  { %1615 = vmatprep.subr.mxu0 %v1847_v0  ;;  %1622 = vmatprep.subr.mxu1 %v1847_v0  ;;  %v53_v2 = vld [vmem:[#allocation2] sm:$0xff]  ;;  %v95_v4 = vand.u32 4294901760, %v54_v1  ;;  %v529_v20 = vld [vmem:[%s2152_s3 + $0x18] sm:$0xff]  ;;  %v528_v22 = vld [vmem:[%s2152_s3 + $0x10] sm:$0xff]  ;;  %vm537_vm2 = vcmask 261120   ;;  %vm1526_vm3 = vcmask 31744  }
  0x1e   :  { %1619 = vmatprep.mubr.msk.f32.mxu0 %vm1848_vm0, %v1847_v0  ;;  %1626 = vmatprep.mubr.msk.f32.mxu1 %vm1848_vm0, %v1847_v0  ;;  %v52_v3 = vld [vmem:[%s2149_s0] sm:$0xff]  ;;  %v98_v5 = vand.u32 4294901760, %v53_v2  ;;  %v1931_v21 = vand.u32 4294901760, %v529_v20  ;;  %v527_v23 = vld [vmem:[%s2152_s3 + $0x8] sm:$0xff]  ;;  %v1945_v26 = vand.u32 4294901760, %v528_v22 }
  0x1f   :  { %v64_v6 = vsel %vm62_vm1, %v52_v3, 0  ;;  %1616 = vmatpush3.msra.mxu0 %v95_v4  ;;  %v173_v8 = vsub.f32 %v54_v1, %v95_v4  ;;  %v526_v24 = vld [vmem:[%s2152_s3] sm:$0xff]  ;;  %v1947_v27 = vand.u32 4294901760, %v527_v23 }
  0x20   :  { %v133_v7 = vand.u32 4294901760, %v64_v6  ;;  %v180_v9 = vsub.f32 %v53_v2, %v98_v5  ;;  %1617 = vmatprep.subr.mxu0 %v1847_v0  ;;  %v1943_v25 = vsub.f32 %v529_v20, %v1931_v21  ;;  %v1949_v28 = vand.u32 4294901760, %v526_v24  ;;  %v1534_v44 = vld [vmem:[%s2151_s2] ss:$0 sm:$0xff] }
  0x21   :  { %1618 = vmatpush3.msra.mxu0 %v98_v5  ;;  %v174_v11 = vand.u32 4294901760, %v173_v8  ;;  %v1955_v30 = vsub.f32 %v528_v22, %v1945_v26  ;;  %v1958_v31 = vsub.f32 %v527_v23, %v1947_v27 }
  0x22   :  { %v134_v10 = vsub.f32 %v64_v6, %v133_v7  ;;  %v181_v12 = vand.u32 4294901760, %v180_v9  ;;  %1629 = vmatprep.subr.mxu0 %v1847_v0  ;;  %v647_v29 = vand.u32 4294901760, %v1943_v25  ;;  %v1961_v32 = vsub.f32 %v526_v24, %v1949_v28 }
  0x23   :  { %v175_v14 = vsub.f32 %v173_v8, %v174_v11  ;;  %v654_v34 = vand.u32 4294901760, %v1955_v30  ;;  %v661_v35 = vand.u32 4294901760, %v1958_v31 }
  0x24   :  { %v135_v13 = vand.u32 4294901760, %v134_v10  ;;  %v182_v15 = vsub.f32 %v180_v9, %v181_v12  ;;  %v648_v33 = vsub.f32 %v1943_v25, %v647_v29  ;;  %v668_v36 = vand.u32 4294901760, %v1961_v32 }
  0x25   :  { %v176_v17 = vand.u32 4294901760, %v175_v14  ;;  %v655_v38 = vsub.f32 %v1955_v30, %v654_v34  ;;  %v662_v39 = vsub.f32 %v1958_v31, %v661_v35 }
  0x26   :  { %v136_v16 = vsub.f32 %v134_v10, %v135_v13  ;;  %v183_v18 = vand.u32 4294901760, %v182_v15  ;;  %v649_v37 = vand.u32 4294901760, %v648_v33  ;;  %v669_v40 = vsub.f32 %v1961_v32, %v668_v36 }
  0x27   :  { %1623 = vmatpush3.msra.mxu1 %v176_v17  ;;  %v656_v41 = vand.u32 4294901760, %v655_v38  ;;  %v663_v42 = vand.u32 4294901760, %v662_v39 }
  0x28   :  { %v137_v19 = vand.u32 4294901760, %v136_v16  ;;  %1624 = vmatprep.subr.mxu1 %v1847_v0  ;;  %v670_v43 = vand.u32 4294901760, %v669_v40 }
  0x29   :  { %1625 = vmatpush3.msra.mxu1 %v183_v18 }
  0x2a   :  { %1620 = vmatmul.mubr.f32.vlgmr.msra.gmra.mxu0 %v137_v19  ;;  %1627 = vmatmul.mubr.f32.vlgmr.msra.gmra.mxu1 %v133_v7 }
  0x2b   :  { %1630 = vmatpush3.msra.mxu0 %v173_v8  ;;  %1636 = vmatprep.subr.mxu1 %v1847_v0 }
  0x2c   :  { %1631 = vmatprep.subr.mxu0 %v1847_v0  ;;  %1633 = vmatprep.mubr.msk.f32.mxu0 %vm1848_vm0, %v1847_v0 }
  0x2d   :  { %1632 = vmatpush3.msra.mxu0 %v180_v9  ;;  %1637 = vmatpush3.msra.mxu1 %v95_v4  ;;  %v1029_v9 = vld [vmem:[%s2154_s5 + $0x10] sm:$0xff] }
  0x2e   :  { %1634 = vmatmul.mubr.f32.vlgmr.msra.gmra.mxu0 %v134_v10  ;;  %1638 = vmatprep.subr.mxu1 %v1847_v0  ;;  %v1028_v10 = vld [vmem:[%s2154_s5 + $0x8] sm:$0xff] }
  0x2f   :  { %1643 = vmatprep.subr.mxu0 %v1847_v0  ;;  %1639 = vmatpush3.msra.mxu1 %v98_v5  ;;  %v2059_v14 = vand.u32 4294901760, %v1028_v10 }
  0x30   :  { %1640 = vmatprep.mubr.msk.f32.mxu1 %vm1848_vm0, %v1847_v0  ;;  %1644 = vmatpush3.msra.mxu0 %v174_v11  ;;  %v1027_v11 = vld [vmem:[%s2154_s5] sm:$0xff] }
  0x31   :  { %1641 = vmatmul.mubr.f32.vlgmr.msra.gmra.mxu1 %v135_v13  ;;  %1645 = vmatprep.subr.mxu0 %v1847_v0  ;;  %v2057_v13 = vand.u32 4294901760, %v1029_v9  ;;  %v2061_v15 = vand.u32 4294901760, %v1027_v11  ;;  %v2070_v18 = vsub.f32 %v1028_v10, %v2059_v14 }
  0x32   :  { %1650 = vmatprep.subr.mxu1 %v1847_v0  ;;  %1646 = vmatpush3.msra.mxu0 %v181_v12 }
  0x33   :  { %1647 = vmatprep.mubr.msk.f32.mxu0 %vm1848_vm0, %v1847_v0  ;;  %1651 = vmatpush3.msra.mxu1 %v95_v4  ;;  %v2067_v17 = vsub.f32 %v1029_v9, %v2057_v13  ;;  %v2073_v19 = vsub.f32 %v1027_v11, %v2061_v15  ;;  %v1161_v22 = vand.u32 4294901760, %v2070_v18 }
  0x34   :  { %1648 = vmatmul.mubr.f32.vlgmr.msra.gmra.mxu0 %v133_v7  ;;  %1652 = vmatprep.subr.mxu1 %v1847_v0 }
  0x35   :  { %1653 = vmatpush3.msra.mxu1 %v98_v5  ;;  %1654 = vmatprep.mubr.msk.f32.mxu1 %vm1848_vm0, %v1847_v0  ;;  %v1168_v23 = vand.u32 4294901760, %v2073_v19 }
  0x36   :  { %1655 = vmatmul.mubr.f32.vlgmr.msra.gmra.mxu1 %v133_v7  ;;  %1668 = vmatprep.subr.mxu1 %v1847_v0  ;;  %v1030_v7 = vld [vmem:[%s2154_s5 + $0x18] sm:$0xff] }
  0x37   :  { %1657 = vmatprep.subr.mxu0 %v1847_v0  ;;  %1676 = vmatprep.mubr.msk.f32.mxu1 %vm1848_vm0, %v1847_v0  ;;  %v2043_v8 = vand.u32 4294901760, %v1030_v7 }
  0x38   :  { %1665 = vmatprep.mubr.msk.f32.mxu0 %vm1848_vm0, %v1847_v0  ;;  %1658 = vmatpush3.msra.mxu0 %v1931_v21 }
  0x39   :  { %1659 = vmatprep.subr.mxu0 %v1847_v0  ;;  %1669 = vmatpush3.msra.mxu1 %v649_v37  ;;  %v2055_v12 = vsub.f32 %v1030_v7, %v2043_v8  ;;  %v1535_v37 = vld [vmem:[#allocation4] ss:$0 sm:$0xff] }
  0x3a   :  { %1660 = vmatpush3.msra.mxu0 %v1945_v26  ;;  %1670 = vmatprep.subr.mxu1 %v1847_v0 }
  0x3b   :  { %1661 = vmatprep.subr.mxu0 %v1847_v0  ;;  %1671 = vmatpush3.msra.mxu1 %v656_v41  ;;  %v1147_v16 = vand.u32 4294901760, %v2055_v12 }
  0x3c   :  { %1662 = vmatpush3.msra.mxu0 %v1947_v27  ;;  %1672 = vmatprep.subr.mxu1 %v1847_v0 }
  0x3d   :  { %1663 = vmatprep.subr.mxu0 %v1847_v0  ;;  %1673 = vmatpush3.msra.mxu1 %v663_v42  ;;  %v1148_v20 = vsub.f32 %v2055_v12, %v1147_v16 }
  0x3e   :  { %1664 = vmatpush3.msra.mxu0 %v1949_v28  ;;  %1674 = vmatprep.subr.mxu1 %v1847_v0 }
  0x3f   :  { %1679 = vmatprep.subr.mxu0 %v1847_v0  ;;  %1675 = vmatpush3.msra.mxu1 %v670_v43  ;;  %v1149_v24 = vand.u32 4294901760, %v1148_v20 }
  0x40   :  { %1690 = vmatprep.subr.mxu1 %v1847_v0 }
  0xea   :  { %v139_v45 = vpop.f32.mrf.mxu0  ;;  %v220_v48 = vpop.f32.mrf.mxu1 }
  0xeb   :  { %v140_v46 = vadd.f32 %v1534_v44, %v139_v45 }
  0xec   :  { %v1621_v47 = vpop.f32.mrf.mxu0  ;;  %v1628_v50 = vpop.f32.mrf.mxu1 }
  0xed   :  { %v221_v49 = vadd.f32 %v220_v48, %v140_v46 }
  0xee   :  { %v296_v51 = vpop.f32.mrf.mxu0 }
  0xef   :  { %v297_v52 = vadd.f32 %v296_v51, %v221_v49 }
  0xf0   :  { %v1635_v53 = vpop.f32.mrf.mxu0 }
  0xf1   :  { %v371_v54 = vpop.f32.mrf.mxu1 }
  0xf2   :  { %v372_v55 = vadd.f32 %v371_v54, %v297_v52 }
  0xf3   :  { %v1642_v56 = vpop.f32.mrf.mxu1 }
  0xf4   :  { %v448_v57 = vpop.f32.mrf.mxu0 }
  0xf5   :  { %v449_v58 = vadd.f32 %v448_v57, %v372_v55 }
  0xf6   :  { %v1649_v59 = vpop.f32.mrf.mxu0  ;;  %v521_v60 = vpop.f32.mrf.mxu1 }
  0xf7   :  { %v522_v61 = vadd.f32 %v521_v60, %v449_v58 }
  0xf8   :  { %v1656_v62 = vpop.f32.mrf.mxu1 }
  0xf9   :  { %1795 = vtanh.f32 %v522_v61 }
 0x106   :  { %v1796_v63 = vpop.eup %1795 }
 0x107   :  { %v539_v1 = vsel %vm537_vm2, %v1796_v63, 0  ;;  %v1536_v63 = vld [vmem:[%s2155_s6] ss:$0 sm:$0xff] }
 0x108   :  { %v610_v2 = vand.u32 4294901760, %v539_v1 }
 0x10a   :  { %v611_v3 = vsub.f32 %v539_v1, %v610_v2  ;;  %1677 = vmatmul.mubr.f32.vlgmr.msra.gmra.mxu1 %v610_v2 }
 0x10b   :  { %1691 = vmatpush3.msra.mxu1 %v1931_v21  ;;  %1698 = vmatprep.mubr.msk.f32.mxu1 %vm1848_vm0, %v1847_v0 }
 0x10c   :  { %1692 = vmatprep.subr.mxu1 %v1847_v0  ;;  %v612_v4 = vand.u32 4294901760, %v611_v3 }
 0x10d   :  { %1693 = vmatpush3.msra.mxu1 %v1945_v26 }
 0x10e   :  { %1694 = vmatprep.subr.mxu1 %v1847_v0  ;;  %v613_v5 = vsub.f32 %v611_v3, %v612_v4 }
 0x10f   :  { %1695 = vmatpush3.msra.mxu1 %v1947_v27 }
 0x110   :  { %1696 = vmatprep.subr.mxu1 %v1847_v0  ;;  %v614_v6 = vand.u32 4294901760, %v613_v5 }
 0x111   :  { %1697 = vmatpush3.msra.mxu1 %v1949_v28 }
 0x112   :  { %1699 = vmatmul.mubr.f32.vlgmr.msra.gmra.mxu1 %v612_v4  ;;  %1712 = vmatprep.subr.mxu1 %v1847_v0 }
 0x113   :  { %1666 = vmatmul.mubr.f32.vlgmr.msra.gmra.mxu0 %v614_v6  ;;  %1713 = vmatpush3.msra.mxu1 %v1931_v21  ;;  %v1154_v21 = vand.u32 4294901760, %v2067_v17 }
 0x114   :  { %1680 = vmatpush3.msra.mxu0 %v1943_v25  ;;  %1714 = vmatprep.subr.mxu1 %v1847_v0 }
 0x115   :  { %1681 = vmatprep.subr.mxu0 %v1847_v0  ;;  %1715 = vmatpush3.msra.mxu1 %v1945_v26  ;;  %v1155_v25 = vsub.f32 %v2067_v17, %v1154_v21  ;;  %v1162_v26 = vsub.f32 %v2070_v18, %v1161_v22 }
 0x116   :  { %1682 = vmatpush3.msra.mxu0 %v1955_v30  ;;  %1716 = vmatprep.subr.mxu1 %v1847_v0 }
 0x117   :  { %1683 = vmatprep.subr.mxu0 %v1847_v0  ;;  %1717 = vmatpush3.msra.mxu1 %v1947_v27  ;;  %v1169_v27 = vsub.f32 %v2073_v19, %v1168_v23 }
 0x118   :  { %1684 = vmatpush3.msra.mxu0 %v1958_v31  ;;  %1718 = vmatprep.subr.mxu1 %v1847_v0 }
 0x119   :  { %1685 = vmatprep.subr.mxu0 %v1847_v0  ;;  %1687 = vmatprep.mubr.msk.f32.mxu0 %vm1848_vm0, %v1847_v0  ;;  %v1170_v30 = vand.u32 4294901760, %v1169_v27 }
 0x11a   :  { %1686 = vmatpush3.msra.mxu0 %v1961_v32  ;;  %1719 = vmatpush3.msra.mxu1 %v1949_v28  ;;  %v1156_v28 = vand.u32 4294901760, %v1155_v25 }
 0x11b   :  { %1720 = vmatprep.mubr.msk.f32.mxu1 %vm1848_vm0, %v1847_v0  ;;  %1688 = vmatmul.mubr.f32.vlgmr.msra.gmra.mxu0 %v611_v3 }
 0x11c   :  { %1701 = vmatprep.subr.mxu0 %v1847_v0  ;;  %1721 = vmatmul.mubr.f32.vlgmr.msra.gmra.mxu1 %v610_v2 }
 0x11d   :  { %1702 = vmatpush3.msra.mxu0 %v647_v29  ;;  %1709 = vmatprep.mubr.msk.f32.mxu0 %vm1848_vm0, %v1847_v0  ;;  %v1163_v29 = vand.u32 4294901760, %v1162_v26 }
 0x11e   :  { %1703 = vmatprep.subr.mxu0 %v1847_v0  ;;  %1734 = vmatprep.subr.mxu1 %v1847_v0 }
 0x11f   :  { %1704 = vmatpush3.msra.mxu0 %v654_v34  ;;  %1742 = vmatprep.mubr.msk.f32.mxu1 %vm1848_vm0, %v1847_v0 }
 0x120   :  { %1705 = vmatprep.subr.mxu0 %v1847_v0  ;;  %1735 = vmatpush3.msra.mxu1 %v1149_v24 }
 0x121   :  { %1706 = vmatpush3.msra.mxu0 %v661_v35  ;;  %1736 = vmatprep.subr.mxu1 %v1847_v0 }
 0x122   :  { %1707 = vmatprep.subr.mxu0 %v1847_v0  ;;  %1737 = vmatpush3.msra.mxu1 %v1156_v28 }
 0x123   :  { %1708 = vmatpush3.msra.mxu0 %v668_v36  ;;  %1738 = vmatprep.subr.mxu1 %v1847_v0 }
 0x124   :  { %1710 = vmatmul.mubr.f32.vlgmr.msra.gmra.mxu0 %v610_v2  ;;  %1723 = vmatprep.subr.mxu0 %v1847_v0 }
 0x125   :  { %1731 = vmatprep.mubr.msk.f32.mxu0 %vm1848_vm0, %v1847_v0  ;;  %1724 = vmatpush3.msra.mxu0 %v2043_v8 }
 0x126   :  { %1725 = vmatprep.subr.mxu0 %v1847_v0  ;;  %1739 = vmatpush3.msra.mxu1 %v1163_v29 }
 0x127   :  { %1726 = vmatpush3.msra.mxu0 %v2057_v13  ;;  %1740 = vmatprep.subr.mxu1 %v1847_v0 }
 0x128   :  { %1727 = vmatprep.subr.mxu0 %v1847_v0  ;;  %1741 = vmatpush3.msra.mxu1 %v1170_v30 }
 0x129   :  { %1728 = vmatpush3.msra.mxu0 %v2059_v14  ;;  %1756 = vmatprep.subr.mxu1 %v1847_v0 }
 0x12a   :  { %1729 = vmatprep.subr.mxu0 %v1847_v0 }
 0x12b   :  { %1730 = vmatpush3.msra.mxu0 %v2061_v15 }
 0x12c   :  { %1745 = vmatprep.subr.mxu0 %v1847_v0 }
 0x1ca   :  { %v707_v31 = vpop.f32.mrf.mxu1 }
 0x1cc   :  { %v1678_v32 = vpop.f32.mrf.mxu1 }
 0x1d2   :  { %v864_v33 = vpop.f32.mrf.mxu1 }
 0x1d3   :  { %v616_v34 = vpop.f32.mrf.mxu0 }
 0x1d4   :  { %v1700_v35 = vpop.f32.mrf.mxu1  ;;  %v617_v38 = vadd.f32 %v1535_v37, %v616_v34 }
 0x1d5   :  { %v1667_v36 = vpop.f32.mrf.mxu0 }
 0x1d6   :  { %v708_v41 = vadd.f32 %v707_v31, %v617_v38 }
 0x1db   :  { %v787_v39 = vpop.f32.mrf.mxu0 }
 0x1dc   :  { %v1022_v40 = vpop.f32.mrf.mxu1  ;;  %v788_v44 = vadd.f32 %v787_v39, %v708_v41 }
 0x1dd   :  { %v1689_v42 = vpop.f32.mrf.mxu0 }
 0x1de   :  { %v1722_v43 = vpop.f32.mrf.mxu1  ;;  %v865_v45 = vadd.f32 %v864_v33, %v788_v44 }
 0x1e4   :  { %v947_v46 = vpop.f32.mrf.mxu0 }
 0x1e5   :  { %v948_v47 = vadd.f32 %v947_v46, %v865_v45 }
 0x1e6   :  { %v1711_v48 = vpop.f32.mrf.mxu0 }
 0x1e7   :  { %v1023_v49 = vadd.f32 %v1022_v40, %v948_v47 }
 0x1e9   :  { %1797 = vtanh.f32 %v1023_v49 }
 0x1f6   :  { %v1798_v50 = vpop.eup %1797 }
 0x1f7   :  { %v1039_v51 = vsel %vm537_vm2, %v1798_v50, 0 }
 0x1f8   :  { %v1110_v52 = vand.u32 4294901760, %v1039_v51 }
 0x1fa   :  { %v1111_v53 = vsub.f32 %v1039_v51, %v1110_v52  ;;  %1743 = vmatmul.mubr.f32.vlgmr.msra.gmra.mxu1 %v1110_v52 }
 0x1fb   :  { %1757 = vmatpush3.msra.mxu1 %v2043_v8  ;;  %1764 = vmatprep.mubr.msk.f32.mxu1 %vm1848_vm0, %v1847_v0 }
 0x1fc   :  { %1758 = vmatprep.subr.mxu1 %v1847_v0  ;;  %v1112_v54 = vand.u32 4294901760, %v1111_v53 }
 0x1fd   :  { %1759 = vmatpush3.msra.mxu1 %v2057_v13 }
 0x1fe   :  { %1760 = vmatprep.subr.mxu1 %v1847_v0  ;;  %v1113_v55 = vsub.f32 %v1111_v53, %v1112_v54 }
 0x1ff   :  { %1761 = vmatpush3.msra.mxu1 %v2059_v14 }
 0x200   :  { %1762 = vmatprep.subr.mxu1 %v1847_v0  ;;  %v1114_v56 = vand.u32 4294901760, %v1113_v55 }
 0x201   :  { %1763 = vmatpush3.msra.mxu1 %v2061_v15 }
 0x202   :  { %1765 = vmatmul.mubr.f32.vlgmr.msra.gmra.mxu1 %v1112_v54  ;;  %1778 = vmatprep.subr.mxu1 %v1847_v0 }
 0x203   :  { %1732 = vmatmul.mubr.f32.vlgmr.msra.gmra.mxu0 %v1114_v56  ;;  %1779 = vmatpush3.msra.mxu1 %v2043_v8 }
 0x204   :  { %1746 = vmatpush3.msra.mxu0 %v2055_v12  ;;  %1780 = vmatprep.subr.mxu1 %v1847_v0 }
 0x205   :  { %1747 = vmatprep.subr.mxu0 %v1847_v0  ;;  %1781 = vmatpush3.msra.mxu1 %v2057_v13 }
 0x206   :  { %1748 = vmatpush3.msra.mxu0 %v2067_v17  ;;  %1782 = vmatprep.subr.mxu1 %v1847_v0 }
 0x207   :  { %1749 = vmatprep.subr.mxu0 %v1847_v0  ;;  %1783 = vmatpush3.msra.mxu1 %v2059_v14 }
 0x208   :  { %1750 = vmatpush3.msra.mxu0 %v2070_v18  ;;  %1784 = vmatprep.subr.mxu1 %v1847_v0 }
 0x209   :  { %1751 = vmatprep.subr.mxu0 %v1847_v0  ;;  %1753 = vmatprep.mubr.msk.f32.mxu0 %vm1848_vm0, %v1847_v0 }
 0x20a   :  { %1752 = vmatpush3.msra.mxu0 %v2073_v19  ;;  %1785 = vmatpush3.msra.mxu1 %v2061_v15 }
 0x20b   :  { %1786 = vmatprep.mubr.msk.f32.mxu1 %vm1848_vm0, %v1847_v0  ;;  %1754 = vmatmul.mubr.f32.vlgmr.msra.gmra.mxu0 %v1111_v53 }
 0x20c   :  { %1767 = vmatprep.subr.mxu0 %v1847_v0  ;;  %1787 = vmatmul.mubr.f32.vlgmr.msra.gmra.mxu1 %v1110_v52 }
 0x20d   :  { %1768 = vmatpush3.msra.mxu0 %v1147_v16  ;;  %1775 = vmatprep.mubr.msk.f32.mxu0 %vm1848_vm0, %v1847_v0 }
 0x20e   :  { %1769 = vmatprep.subr.mxu0 %v1847_v0 }
 0x20f   :  { %1770 = vmatpush3.msra.mxu0 %v1154_v21 }
 0x210   :  { %1771 = vmatprep.subr.mxu0 %v1847_v0 }
 0x211   :  { %1772 = vmatpush3.msra.mxu0 %v1161_v22 }
 0x212   :  { %1773 = vmatprep.subr.mxu0 %v1847_v0 }
 0x213   :  { %1774 = vmatpush3.msra.mxu0 %v1168_v23 }
 0x214   :  { %1776 = vmatmul.mubr.f32.vlgmr.msra.gmra.mxu0 %v1110_v52 }
 0x2ba   :  { %v1207_v57 = vpop.f32.mrf.mxu1 }
 0x2bc   :  { %v1744_v58 = vpop.f32.mrf.mxu1 }
 0x2c2   :  { %v1364_v59 = vpop.f32.mrf.mxu1 }
 0x2c3   :  { %v1116_v60 = vpop.f32.mrf.mxu0 }
 0x2c4   :  { %v1766_v61 = vpop.f32.mrf.mxu1  ;;  %v1117_v1 = vadd.f32 %v1536_v63, %v1116_v60 }
 0x2c5   :  { %v1733_v62 = vpop.f32.mrf.mxu0 }
 0x2c6   :  { %v1208_v4 = vadd.f32 %v1207_v57, %v1117_v1 }
 0x2cb   :  { %v1287_v2 = vpop.f32.mrf.mxu0 }
 0x2cc   :  { %v1522_v3 = vpop.f32.mrf.mxu1  ;;  %v1288_v6 = vadd.f32 %v1287_v2, %v1208_v4 }
 0x2cd   :  { %v1755_v5 = vpop.f32.mrf.mxu0 }
 0x2ce   :  { %v1788_v0 = vpop.f32.mrf.mxu1  ;;  %v1365_v7 = vadd.f32 %v1364_v59, %v1288_v6 }
 0x2d4   :  { %v1447_v8 = vpop.f32.mrf.mxu0 }
 0x2d5   :  { %v1448_v9 = vadd.f32 %v1447_v8, %v1365_v7 }
 0x2d6   :  { %v1777_v10 = vpop.f32.mrf.mxu0 }
 0x2d7   :  { %v1523_v11 = vadd.f32 %v1522_v3, %v1448_v9 }
 0x2d9   :  { %1527 = vst.msk [vmem:[%s2156_s7] sm:$0xff] %vm1526_vm3, %v1523_v11 }
 0x2da   :  { %1532 = vsyncpa [#allocation3], 1 }
 0x2db   :  { %1533 = vsyncpa [#allocation5], 1 }

</bundles_post_ra>
